<compile_context>
chip_gen: v7x
topology: tpu7x:2x2x1
jax: 0.10.0
libtpu: 0.0.40
codegen_flags: <defaults>
</compile_context>

<pallas_src>
import functools
import math

import jax
import jax.numpy as jnp
from jax import lax
from jax.experimental import pallas as pl
from jax.experimental.pallas import tpu as pltpu


def _mha_kernel(xq_ref, xkv_ref,
                wq_ref, wkv_ref,
                bq_ref, bkv_ref,
                wo_ref, bo_ref,
                o_ref, *, h, d_head):
    # xq_ref : [1, tq, D]      query rows for this grid step
    # xkv_ref: [1, L,  D]      full sequence (keys/values)
    # wq_ref : [D, D]          pre-transposed so  q = x @ wq + bq
    # wkv_ref: [D, 2D]         fused, pre-transposed K|V projection
    # bq_ref : [1, D]; bkv_ref: [1, 2D]
    # wo_ref : [h, d_head, D]  output projection split per head (pre-reshaped)
    # bo_ref : [1, D]
    # o_ref  : [1, tq, D]
    x_q = xq_ref[0]                       # [tq, D], native dtype (bf16 stays bf16)
    x_kv = xkv_ref[0]                     # [L,  D]
    cdt = x_q.dtype                       # MXU operand dtype
    d_model = h * d_head

    # Projections: native-dtype operands into the MXU, f32 accumulation.
    q = jnp.dot(x_q, wq_ref[...], preferred_element_type=jnp.float32) \
        + bq_ref[...].astype(jnp.float32)                          # [tq, D] f32
    kv = jnp.dot(x_kv, wkv_ref[...], preferred_element_type=jnp.float32) \
        + bkv_ref[...].astype(jnp.float32)                         # [L, 2D] f32
    k = kv[:, :d_model]                                            # [L, D] f32 (lane-aligned)
    v = kv[:, d_model:]                                            # [L, D] f32 (lane-aligned)

    inv_scale = 1.0 / math.sqrt(d_head)
    # Scale q once (cheaper than scaling every [tq, L] score matrix).
    qc = (q * inv_scale).astype(cdt)      # [tq, D]
    kc = k.astype(cdt)                    # [L, D]
    vc = v.astype(cdt)                    # [L, D]

    tq = qc.shape[0]

    # Accumulate the output projection per head -> no head concat, single
    # lane-dense [tq, D] result.
    acc = jnp.zeros((tq, d_model), dtype=jnp.float32)
    for hh in range(h):                                  # static unroll over heads
        sl = slice(hh * d_head, (hh + 1) * d_head)
        qh = qc[:, sl]                                   # [tq, d_head]
        kh = kc[:, sl]                                   # [L,  d_head]
        vh = vc[:, sl]                                   # [L,  d_head]

        # q @ k^T expressed as a contraction (no materialized transpose).
        scores = lax.dot_general(
            qh, kh, (((1,), (1,)), ((), ())),
            preferred_element_type=jnp.float32)          # [tq, L] f32

        # Numerically-stable softmax; elementwise math stays f32 (v5e-safe).
        # TODO(synk): optional attention mask (masked_fill == -inf) not wired in;
        # mask=None path only.
        m = jnp.max(scores, axis=-1, keepdims=True)
        e = jnp.exp(scores - m)
        s = jnp.sum(e, axis=-1, keepdims=True)
        p = e * pl.reciprocal(s, approx=True)            # [tq, L] f32
        # dropout == identity (eval mode)

        ctx = jnp.dot(p.astype(cdt), vh,
                      preferred_element_type=jnp.float32)  # [tq, d_head] f32
        # Fold the output projection for this head directly into the accumulator.
        acc = acc + jnp.dot(ctx.astype(cdt), wo_ref[hh],
                            preferred_element_type=jnp.float32)  # [tq, D]

    out = acc + bo_ref[...].astype(jnp.float32)          # [tq, D]
    o_ref[0] = out.astype(o_ref.dtype)


def _pick_tq(length):
    """Query-tile size: full length when small, else a 128/256-aligned tile."""
    if length <= 256:
        return length
    for t in (256, 128):
        if length % t == 0:
            return t
    return length


def multi_head_attention(x, w_qkv, b_qkv, w_o, b_o, *, h):
    """x: [B, L, D];  w_qkv: [3D, D] (torch layout);  w_o: [D, D] (torch layout)."""
    B, L, D = x.shape
    assert D % h == 0
    d_head = D // h
    tq = _pick_tq(L)
    n_q = L // tq

    # Glue (plain JAX): split / transpose torch-layout weights into
    # matmul-friendly layouts, cast to the activation dtype for native MXU feed.
    wq_t = jnp.transpose(w_qkv[:D]).astype(x.dtype)               # [D, D]
    wkv_t = jnp.transpose(w_qkv[D:]).astype(x.dtype)              # [D, 2D] fused K|V
    bq = b_qkv[:D].reshape(1, D)
    bkv = b_qkv[D:].reshape(1, 2 * D)
    # Output projection: out = concat_h(ctx_h) @ w_o.T + b_o.  w_o.T rows are
    # ordered (head, d_head), so reshape to per-head blocks [h, d_head, D].
    wo_heads = jnp.transpose(w_o).reshape(h, d_head, D).astype(x.dtype)
    bo = b_o.reshape(1, D)

    kernel = functools.partial(_mha_kernel, h=h, d_head=d_head)

    # Note: weight/bias index_maps are grid-invariant, so their tiles are not
    # re-fetched across grid steps.
    return pl.pallas_call(
        kernel,
        out_shape=jax.ShapeDtypeStruct((B, L, D), x.dtype),
        grid_spec=pltpu.PrefetchScalarGridSpec(
            num_scalar_prefetch=0,
            grid=(B, n_q),
            in_specs=[
                pl.BlockSpec((1, tq, D), lambda b, qi: (b, qi, 0)),     # x (queries)
                pl.BlockSpec((1, L, D), lambda b, qi: (b, 0, 0)),       # x (keys/vals)
                pl.BlockSpec((D, D), lambda b, qi: (0, 0)),             # wq
                pl.BlockSpec((D, 2 * D), lambda b, qi: (0, 0)),         # wkv (fused)
                pl.BlockSpec((1, D), lambda b, qi: (0, 0)),             # bq
                pl.BlockSpec((1, 2 * D), lambda b, qi: (0, 0)),         # bkv (fused)
                pl.BlockSpec((h, d_head, D), lambda b, qi: (0, 0, 0)),  # wo per head
                pl.BlockSpec((1, D), lambda b, qi: (0, 0)),             # bo
            ],
            out_specs=pl.BlockSpec((1, tq, D), lambda b, qi: (b, qi, 0)),
        ),
        compiler_params=pltpu.CompilerParams(
            dimension_semantics=("parallel", "parallel"),
            # Sized for v7x's 64 MiB VMEM (leaves headroom); fits v5e/v6e too.
            vmem_limit_bytes=48 * 1024 * 1024,
        ),
    )(x, x, wq_t, wkv_t, bq, bkv, wo_heads, bo)


def _reference_mha(x, w_qkv, b_qkv, w_o, b_o, *, h):
    """Pure-JAX mirror of the PyTorch forward (eval mode, mask=None)."""
    B, L, D = x.shape
    d_head = D // h
    qkv = jnp.einsum("bld,ed->ble", x, w_qkv) + b_qkv            # [B, L, 3D]
    qkv = qkv.reshape(B, L, 3, h, d_head)                        # (three h d) split
    q, k, v = qkv[:, :, 0], qkv[:, :, 1], qkv[:, :, 2]           # [B, L, h, d]
    attn = jnp.einsum("bqhd,bkhd->bhqk", q, k) / math.sqrt(d_head)
    p = jax.nn.softmax(attn, axis=-1)
    o = jnp.einsum("bhqk,bkhd->bqhd", p, v).reshape(B, L, D)
    return jnp.einsum("bld,ed->ble", o, w_o) + b_o


if __name__ == "__main__":
    # Small config consistent with the module: lane-dense d_model=128, h=4 heads,
    # d_head=32, seq=8, batch=2 (keeps both v7x TensorCores busy).
    B, L, D, H = 2, 8, 128, 4

    key = jax.random.PRNGKey(0)
    kx, k1, k2, k3, k4 = jax.random.split(key, 5)

    x = jax.random.normal(kx, (B, L, D), dtype=jnp.float32)
    # nn.Linear(d_model, 3*d_model): weight [3D, D], bias [3D]
    w_qkv = jax.random.normal(k1, (3 * D, D), dtype=jnp.float32) * (1.0 / math.sqrt(D))
    b_qkv = jax.random.normal(k2, (3 * D,), dtype=jnp.float32) * 0.02
    # nn.Linear(d_model, d_model): weight [D, D], bias [D]
    w_o = jax.random.normal(k3, (D, D), dtype=jnp.float32) * (1.0 / math.sqrt(D))
    b_o = jax.random.normal(k4, (D,), dtype=jnp.float32) * 0.02

    out = multi_head_attention(x, w_qkv, b_qkv, w_o, b_o, h=H)
    out = jax.block_until_ready(out)

    ref = _reference_mha(x, w_qkv, b_qkv, w_o, b_o, h=H)
    assert out.shape == (B, L, D)
    # Tolerance accounts for the EUP approximate reciprocal in the softmax.
    assert jnp.allclose(out, ref, atol=2e-2, rtol=2e-2), "mismatch vs reference"

    print("KERNEL_OK")
</pallas_src>

<mosaic_0001>
module attributes {stable_mosaic.version = 11 : i64} {
  func.func @_mha_kernel(%arg0: i32, %arg1: i32, %arg2: memref<1x8x128xf32, #tpu.memory_space<vmem>>, %arg3: memref<1x8x128xf32, #tpu.memory_space<vmem>>, %arg4: memref<128x128xf32, #tpu.memory_space<vmem>>, %arg5: memref<128x256xf32, #tpu.memory_space<vmem>>, %arg6: memref<1x128xf32, #tpu.memory_space<vmem>>, %arg7: memref<1x256xf32, #tpu.memory_space<vmem>>, %arg8: memref<4x32x128xf32, #tpu.memory_space<vmem>>, %arg9: memref<1x128xf32, #tpu.memory_space<vmem>>, %arg10: memref<1x8x128xf32, #tpu.memory_space<vmem>>) attributes {dimension_semantics = [#tpu.dimension_semantics<parallel>, #tpu.dimension_semantics<parallel>], iteration_bounds = array<i64: 2, 1>, scalar_prefetch = 0 : i64, scratch_operands = 0 : i64, tpu.core_type = #tpu.core_type<tc>, window_params = [{transform_indices = @transform_0, window_bounds = array<i64: 1, 8, 128>}, {transform_indices = @transform_1, window_bounds = array<i64: 1, 8, 128>}, {pipeline_mode = #tpu.pipeline_mode<synchronous>, transform_indices = @transform_2, window_bounds = array<i64: 128, 128>}, {pipeline_mode = #tpu.pipeline_mode<synchronous>, transform_indices = @transform_3, window_bounds = array<i64: 128, 256>}, {pipeline_mode = #tpu.pipeline_mode<synchronous>, transform_indices = @transform_4, window_bounds = array<i64: 1, 128>}, {pipeline_mode = #tpu.pipeline_mode<synchronous>, transform_indices = @transform_5, window_bounds = array<i64: 1, 256>}, {pipeline_mode = #tpu.pipeline_mode<synchronous>, transform_indices = @transform_6, window_bounds = array<i64: 4, 32, 128>}, {pipeline_mode = #tpu.pipeline_mode<synchronous>, transform_indices = @transform_7, window_bounds = array<i64: 1, 128>}, {transform_indices = @transform_8, window_bounds = array<i64: 1, 8, 128>}]} {
    %c0 = arith.constant 0 : index
    %c0_0 = arith.constant 0 : index
    %c0_1 = arith.constant 0 : index
    %0 = vector.load %arg2[%c0, %c0_0, %c0_1] : memref<1x8x128xf32, #tpu.memory_space<vmem>>, vector<1x8x128xf32>
    %1 = vector.shape_cast %0 : vector<1x8x128xf32> to vector<8x128xf32>
    %c0_2 = arith.constant 0 : index
    %c0_3 = arith.constant 0 : index
    %c0_4 = arith.constant 0 : index
    %2 = vector.load %arg3[%c0_2, %c0_3, %c0_4] : memref<1x8x128xf32, #tpu.memory_space<vmem>>, vector<1x8x128xf32>
    %3 = vector.shape_cast %2 : vector<1x8x128xf32> to vector<8x128xf32>
    %c0_5 = arith.constant 0 : index
    %c0_6 = arith.constant 0 : index
    %4 = vector.load %arg4[%c0_5, %c0_6] : memref<128x128xf32, #tpu.memory_space<vmem>>, vector<128x128xf32>
    %cst = arith.constant dense<0.000000e+00> : vector<8x128xf32>
    %5 = tpu.matmul %1, %4, %cst {dimension_numbers = #tpu.dot_dimension_numbers<[1], [0], [0], [1], [0, 0, 1, 1], [], []>} : vector<8x128xf32>, vector<128x128xf32>, vector<8x128xf32> -> vector<8x128xf32>
    %c0_7 = arith.constant 0 : index
    %c0_8 = arith.constant 0 : index
    %6 = vector.load %arg6[%c0_7, %c0_8] : memref<1x128xf32, #tpu.memory_space<vmem>>, vector<1x128xf32>
    %7 = vector.broadcast %6 : vector<1x128xf32> to vector<8x128xf32>
    %8 = arith.addf %5, %7 : vector<8x128xf32>
    %c0_9 = arith.constant 0 : index
    %c0_10 = arith.constant 0 : index
    %9 = vector.load %arg5[%c0_9, %c0_10] : memref<128x256xf32, #tpu.memory_space<vmem>>, vector<128x256xf32>
    %cst_11 = arith.constant dense<0.000000e+00> : vector<8x256xf32>
    %10 = tpu.matmul %3, %9, %cst_11 {dimension_numbers = #tpu.dot_dimension_numbers<[1], [0], [0], [1], [0, 0, 1, 1], [], []>} : vector<8x128xf32>, vector<128x256xf32>, vector<8x256xf32> -> vector<8x256xf32>
    %c0_12 = arith.constant 0 : index
    %c0_13 = arith.constant 0 : index
    %11 = vector.load %arg7[%c0_12, %c0_13] : memref<1x256xf32, #tpu.memory_space<vmem>>, vector<1x256xf32>
    %12 = vector.broadcast %11 : vector<1x256xf32> to vector<8x256xf32>
    %13 = arith.addf %10, %12 : vector<8x256xf32>
    %14 = vector.extract_strided_slice %13 {offsets = [0, 0], sizes = [8, 128], strides = [1, 1]} : vector<8x256xf32> to vector<8x128xf32>
    %15 = vector.extract_strided_slice %13 {offsets = [0, 128], sizes = [8, 128], strides = [1, 1]} : vector<8x256xf32> to vector<8x128xf32>
    %cst_14 = arith.constant 0.176776692 : f32
    %16 = vector.broadcast %cst_14 : f32 to vector<8x128xf32>
    %17 = arith.mulf %8, %16 : vector<8x128xf32>
    %cst_15 = arith.constant 0.000000e+00 : f32
    %18 = vector.broadcast %cst_15 : f32 to vector<8x128xf32>
    %19 = vector.extract_strided_slice %17 {offsets = [0, 0], sizes = [8, 32], strides = [1, 1]} : vector<8x128xf32> to vector<8x32xf32>
    %20 = vector.extract_strided_slice %14 {offsets = [0, 0], sizes = [8, 32], strides = [1, 1]} : vector<8x128xf32> to vector<8x32xf32>
    %21 = vector.extract_strided_slice %15 {offsets = [0, 0], sizes = [8, 32], strides = [1, 1]} : vector<8x128xf32> to vector<8x32xf32>
    %cst_16 = arith.constant dense<0.000000e+00> : vector<8x8xf32>
    %22 = tpu.matmul %19, %20, %cst_16 {dimension_numbers = #tpu.dot_dimension_numbers<[1], [1], [0], [0], [0, 0, 1, 0], [], []>} : vector<8x32xf32>, vector<8x32xf32>, vector<8x8xf32> -> vector<8x8xf32>
    %cst_17 = arith.constant dense<0xFF800000> : vector<8xf32>
    %23 = vector.multi_reduction <maximumf>, %22, %cst_17 [1] : vector<8x8xf32> to vector<8xf32>
    %24 = vector.shape_cast %23 : vector<8xf32> to vector<8x1xf32>
    %25 = vector.broadcast %24 : vector<8x1xf32> to vector<8x8xf32>
    %26 = arith.subf %22, %25 : vector<8x8xf32>
    %27 = math.exp %26 : vector<8x8xf32>
    %cst_18 = arith.constant dense<0.000000e+00> : vector<8xf32>
    %28 = vector.multi_reduction <add>, %27, %cst_18 [1] : vector<8x8xf32> to vector<8xf32>
    %29 = vector.shape_cast %28 : vector<8xf32> to vector<8x1xf32>
    %30 = tpu.reciprocal %29 {approx = true} : vector<8x1xf32> -> vector<8x1xf32>
    %31 = vector.broadcast %30 : vector<8x1xf32> to vector<8x8xf32>
    %32 = arith.mulf %27, %31 : vector<8x8xf32>
    %cst_19 = arith.constant dense<0.000000e+00> : vector<8x32xf32>
    %33 = tpu.matmul %32, %21, %cst_19 {dimension_numbers = #tpu.dot_dimension_numbers<[1], [0], [0], [1], [0, 0, 1, 1], [], []>} : vector<8x8xf32>, vector<8x32xf32>, vector<8x32xf32> -> vector<8x32xf32>
    %c0_20 = arith.constant 0 : index
    %c0_21 = arith.constant 0 : index
    %c0_22 = arith.constant 0 : index
    %34 = vector.load %arg8[%c0_20, %c0_21, %c0_22] : memref<4x32x128xf32, #tpu.memory_space<vmem>>, vector<1x32x128xf32>
    %35 = vector.shape_cast %34 : vector<1x32x128xf32> to vector<32x128xf32>
    %cst_23 = arith.constant dense<0.000000e+00> : vector<8x128xf32>
    %36 = tpu.matmul %33, %35, %cst_23 {dimension_numbers = #tpu.dot_dimension_numbers<[1], [0], [0], [1], [0, 0, 1, 1], [], []>} : vector<8x32xf32>, vector<32x128xf32>, vector<8x128xf32> -> vector<8x128xf32>
    %37 = arith.addf %18, %36 : vector<8x128xf32>
    %38 = vector.extract_strided_slice %17 {offsets = [0, 32], sizes = [8, 32], strides = [1, 1]} : vector<8x128xf32> to vector<8x32xf32>
    %39 = vector.extract_strided_slice %14 {offsets = [0, 32], sizes = [8, 32], strides = [1, 1]} : vector<8x128xf32> to vector<8x32xf32>
    %40 = vector.extract_strided_slice %15 {offsets = [0, 32], sizes = [8, 32], strides = [1, 1]} : vector<8x128xf32> to vector<8x32xf32>
    %cst_24 = arith.constant dense<0.000000e+00> : vector<8x8xf32>
    %41 = tpu.matmul %38, %39, %cst_24 {dimension_numbers = #tpu.dot_dimension_numbers<[1], [1], [0], [0], [0, 0, 1, 0], [], []>} : vector<8x32xf32>, vector<8x32xf32>, vector<8x8xf32> -> vector<8x8xf32>
    %cst_25 = arith.constant dense<0xFF800000> : vector<8xf32>
    %42 = vector.multi_reduction <maximumf>, %41, %cst_25 [1] : vector<8x8xf32> to vector<8xf32>
    %43 = vector.shape_cast %42 : vector<8xf32> to vector<8x1xf32>
    %44 = vector.broadcast %43 : vector<8x1xf32> to vector<8x8xf32>
    %45 = arith.subf %41, %44 : vector<8x8xf32>
    %46 = math.exp %45 : vector<8x8xf32>
    %cst_26 = arith.constant dense<0.000000e+00> : vector<8xf32>
    %47 = vector.multi_reduction <add>, %46, %cst_26 [1] : vector<8x8xf32> to vector<8xf32>
    %48 = vector.shape_cast %47 : vector<8xf32> to vector<8x1xf32>
    %49 = tpu.reciprocal %48 {approx = true} : vector<8x1xf32> -> vector<8x1xf32>
    %50 = vector.broadcast %49 : vector<8x1xf32> to vector<8x8xf32>
    %51 = arith.mulf %46, %50 : vector<8x8xf32>
    %cst_27 = arith.constant dense<0.000000e+00> : vector<8x32xf32>
    %52 = tpu.matmul %51, %40, %cst_27 {dimension_numbers = #tpu.dot_dimension_numbers<[1], [0], [0], [1], [0, 0, 1, 1], [], []>} : vector<8x8xf32>, vector<8x32xf32>, vector<8x32xf32> -> vector<8x32xf32>
    %c1 = arith.constant 1 : index
    %c0_28 = arith.constant 0 : index
    %c0_29 = arith.constant 0 : index
    %53 = vector.load %arg8[%c1, %c0_28, %c0_29] : memref<4x32x128xf32, #tpu.memory_space<vmem>>, vector<1x32x128xf32>
    %54 = vector.shape_cast %53 : vector<1x32x128xf32> to vector<32x128xf32>
    %cst_30 = arith.constant dense<0.000000e+00> : vector<8x128xf32>
    %55 = tpu.matmul %52, %54, %cst_30 {dimension_numbers = #tpu.dot_dimension_numbers<[1], [0], [0], [1], [0, 0, 1, 1], [], []>} : vector<8x32xf32>, vector<32x128xf32>, vector<8x128xf32> -> vector<8x128xf32>
    %56 = arith.addf %37, %55 : vector<8x128xf32>
    %57 = vector.extract_strided_slice %17 {offsets = [0, 64], sizes = [8, 32], strides = [1, 1]} : vector<8x128xf32> to vector<8x32xf32>
    %58 = vector.extract_strided_slice %14 {offsets = [0, 64], sizes = [8, 32], strides = [1, 1]} : vector<8x128xf32> to vector<8x32xf32>
    %59 = vector.extract_strided_slice %15 {offsets = [0, 64], sizes = [8, 32], strides = [1, 1]} : vector<8x128xf32> to vector<8x32xf32>
    %cst_31 = arith.constant dense<0.000000e+00> : vector<8x8xf32>
    %60 = tpu.matmul %57, %58, %cst_31 {dimension_numbers = #tpu.dot_dimension_numbers<[1], [1], [0], [0], [0, 0, 1, 0], [], []>} : vector<8x32xf32>, vector<8x32xf32>, vector<8x8xf32> -> vector<8x8xf32>
    %cst_32 = arith.constant dense<0xFF800000> : vector<8xf32>
    %61 = vector.multi_reduction <maximumf>, %60, %cst_32 [1] : vector<8x8xf32> to vector<8xf32>
    %62 = vector.shape_cast %61 : vector<8xf32> to vector<8x1xf32>
    %63 = vector.broadcast %62 : vector<8x1xf32> to vector<8x8xf32>
    %64 = arith.subf %60, %63 : vector<8x8xf32>
    %65 = math.exp %64 : vector<8x8xf32>
    %cst_33 = arith.constant dense<0.000000e+00> : vector<8xf32>
    %66 = vector.multi_reduction <add>, %65, %cst_33 [1] : vector<8x8xf32> to vector<8xf32>
    %67 = vector.shape_cast %66 : vector<8xf32> to vector<8x1xf32>
    %68 = tpu.reciprocal %67 {approx = true} : vector<8x1xf32> -> vector<8x1xf32>
    %69 = vector.broadcast %68 : vector<8x1xf32> to vector<8x8xf32>
    %70 = arith.mulf %65, %69 : vector<8x8xf32>
    %cst_34 = arith.constant dense<0.000000e+00> : vector<8x32xf32>
    %71 = tpu.matmul %70, %59, %cst_34 {dimension_numbers = #tpu.dot_dimension_numbers<[1], [0], [0], [1], [0, 0, 1, 1], [], []>} : vector<8x8xf32>, vector<8x32xf32>, vector<8x32xf32> -> vector<8x32xf32>
    %c2 = arith.constant 2 : index
    %c0_35 = arith.constant 0 : index
    %c0_36 = arith.constant 0 : index
    %72 = vector.load %arg8[%c2, %c0_35, %c0_36] : memref<4x32x128xf32, #tpu.memory_space<vmem>>, vector<1x32x128xf32>
    %73 = vector.shape_cast %72 : vector<1x32x128xf32> to vector<32x128xf32>
    %cst_37 = arith.constant dense<0.000000e+00> : vector<8x128xf32>
    %74 = tpu.matmul %71, %73, %cst_37 {dimension_numbers = #tpu.dot_dimension_numbers<[1], [0], [0], [1], [0, 0, 1, 1], [], []>} : vector<8x32xf32>, vector<32x128xf32>, vector<8x128xf32> -> vector<8x128xf32>
    %75 = arith.addf %56, %74 : vector<8x128xf32>
    %76 = vector.extract_strided_slice %17 {offsets = [0, 96], sizes = [8, 32], strides = [1, 1]} : vector<8x128xf32> to vector<8x32xf32>
    %77 = vector.extract_strided_slice %14 {offsets = [0, 96], sizes = [8, 32], strides = [1, 1]} : vector<8x128xf32> to vector<8x32xf32>
    %78 = vector.extract_strided_slice %15 {offsets = [0, 96], sizes = [8, 32], strides = [1, 1]} : vector<8x128xf32> to vector<8x32xf32>
    %cst_38 = arith.constant dense<0.000000e+00> : vector<8x8xf32>
    %79 = tpu.matmul %76, %77, %cst_38 {dimension_numbers = #tpu.dot_dimension_numbers<[1], [1], [0], [0], [0, 0, 1, 0], [], []>} : vector<8x32xf32>, vector<8x32xf32>, vector<8x8xf32> -> vector<8x8xf32>
    %cst_39 = arith.constant dense<0xFF800000> : vector<8xf32>
    %80 = vector.multi_reduction <maximumf>, %79, %cst_39 [1] : vector<8x8xf32> to vector<8xf32>
    %81 = vector.shape_cast %80 : vector<8xf32> to vector<8x1xf32>
    %82 = vector.broadcast %81 : vector<8x1xf32> to vector<8x8xf32>
    %83 = arith.subf %79, %82 : vector<8x8xf32>
    %84 = math.exp %83 : vector<8x8xf32>
    %cst_40 = arith.constant dense<0.000000e+00> : vector<8xf32>
    %85 = vector.multi_reduction <add>, %84, %cst_40 [1] : vector<8x8xf32> to vector<8xf32>
    %86 = vector.shape_cast %85 : vector<8xf32> to vector<8x1xf32>
    %87 = tpu.reciprocal %86 {approx = true} : vector<8x1xf32> -> vector<8x1xf32>
    %88 = vector.broadcast %87 : vector<8x1xf32> to vector<8x8xf32>
    %89 = arith.mulf %84, %88 : vector<8x8xf32>
    %cst_41 = arith.constant dense<0.000000e+00> : vector<8x32xf32>
    %90 = tpu.matmul %89, %78, %cst_41 {dimension_numbers = #tpu.dot_dimension_numbers<[1], [0], [0], [1], [0, 0, 1, 1], [], []>} : vector<8x8xf32>, vector<8x32xf32>, vector<8x32xf32> -> vector<8x32xf32>
    %c3 = arith.constant 3 : index
    %c0_42 = arith.constant 0 : index
    %c0_43 = arith.constant 0 : index
    %91 = vector.load %arg8[%c3, %c0_42, %c0_43] : memref<4x32x128xf32, #tpu.memory_space<vmem>>, vector<1x32x128xf32>
    %92 = vector.shape_cast %91 : vector<1x32x128xf32> to vector<32x128xf32>
    %cst_44 = arith.constant dense<0.000000e+00> : vector<8x128xf32>
    %93 = tpu.matmul %90, %92, %cst_44 {dimension_numbers = #tpu.dot_dimension_numbers<[1], [0], [0], [1], [0, 0, 1, 1], [], []>} : vector<8x32xf32>, vector<32x128xf32>, vector<8x128xf32> -> vector<8x128xf32>
    %94 = arith.addf %75, %93 : vector<8x128xf32>
    %c0_45 = arith.constant 0 : index
    %c0_46 = arith.constant 0 : index
    %95 = vector.load %arg9[%c0_45, %c0_46] : memref<1x128xf32, #tpu.memory_space<vmem>>, vector<1x128xf32>
    %96 = vector.broadcast %95 : vector<1x128xf32> to vector<8x128xf32>
    %97 = arith.addf %94, %96 : vector<8x128xf32>
    %c0_47 = arith.constant 0 : index
    %c0_48 = arith.constant 0 : index
    %c0_49 = arith.constant 0 : index
    %98 = vector.load %arg10[%c0_47, %c0_48, %c0_49] : memref<1x8x128xf32, #tpu.memory_space<vmem>>, vector<1x8x128xf32>
    %99 = vector.shape_cast %98 : vector<1x8x128xf32> to vector<8x128xf32>
    %100 = vector.shape_cast %97 : vector<8x128xf32> to vector<1x8x128xf32>
    tpu.vector_store %arg10[%c0_47, %c0_48, %c0_49], %100 {strides = array<i32>} : memref<1x8x128xf32, #tpu.memory_space<vmem>>, vector<1x8x128xf32>,
    return
  }
  func.func @transform_0(%arg0: i32, %arg1: i32) -> (i32, i32, i32) {
    %c0_i32 = arith.constant 0 : i32
    %c0_i32_0 = arith.constant 0 : i32
    return %arg0, %arg1, %c0_i32 : i32, i32, i32
  }
  func.func @transform_1(%arg0: i32, %arg1: i32) -> (i32, i32, i32) {
    %c0_i32 = arith.constant 0 : i32
    %c0_i32_0 = arith.constant 0 : i32
    %c0_i32_1 = arith.constant 0 : i32
    return %arg0, %c0_i32, %c0_i32_0 : i32, i32, i32
  }
  func.func @transform_2(%arg0: i32, %arg1: i32) -> (i32, i32) {
    %c0_i32 = arith.constant 0 : i32
    %c0_i32_0 = arith.constant 0 : i32
    %c0_i32_1 = arith.constant 0 : i32
    return %c0_i32, %c0_i32_0 : i32, i32
  }
  func.func @transform_3(%arg0: i32, %arg1: i32) -> (i32, i32) {
    %c0_i32 = arith.constant 0 : i32
    %c0_i32_0 = arith.constant 0 : i32
    %c0_i32_1 = arith.constant 0 : i32
    return %c0_i32, %c0_i32_0 : i32, i32
  }
  func.func @transform_4(%arg0: i32, %arg1: i32) -> (i32, i32) {
    %c0_i32 = arith.constant 0 : i32
    %c0_i32_0 = arith.constant 0 : i32
    %c0_i32_1 = arith.constant 0 : i32
    return %c0_i32, %c0_i32_0 : i32, i32
  }
  func.func @transform_5(%arg0: i32, %arg1: i32) -> (i32, i32) {
    %c0_i32 = arith.constant 0 : i32
    %c0_i32_0 = arith.constant 0 : i32
    %c0_i32_1 = arith.constant 0 : i32
    return %c0_i32, %c0_i32_0 : i32, i32
  }
  func.func @transform_6(%arg0: i32, %arg1: i32) -> (i32, i32, i32) {
    %c0_i32 = arith.constant 0 : i32
    %c0_i32_0 = arith.constant 0 : i32
    %c0_i32_1 = arith.constant 0 : i32
    %c0_i32_2 = arith.constant 0 : i32
    return %c0_i32, %c0_i32_0, %c0_i32_1 : i32, i32, i32
  }
  func.func @transform_7(%arg0: i32, %arg1: i32) -> (i32, i32) {
    %c0_i32 = arith.constant 0 : i32
    %c0_i32_0 = arith.constant 0 : i32
    %c0_i32_1 = arith.constant 0 : i32
    return %c0_i32, %c0_i32_0 : i32, i32
  }
  func.func @transform_8(%arg0: i32, %arg1: i32) -> (i32, i32, i32) {
    %c0_i32 = arith.constant 0 : i32
    %c0_i32_0 = arith.constant 0 : i32
    return %arg0, %arg1, %c0_i32 : i32, i32, i32
  }
}

</mosaic_0001>

<bundles_post_ra>
// kernel: tpu_custom_call.1
= control target key start
LH: loop header
LB: loop body
LE: loop exit
PB: predicated region body
PF: predicated region fallthrough
CT: control target
= control target key end

     0   :  { %s2897_s0 = inlined_call_operand.hbm [shape: f32[2,8,128], index: 0, kind: input, shape index: {}]   ;;  %s2898_s1 = inlined_call_operand.hbm [shape: f32[2,8,128], index: 1, kind: input, shape index: {}]   ;;  %s2899_s2 = inlined_call_operand.hbm [shape: f32[128,128], index: 2, kind: input, shape index: {}]   ;;  %s2900_s3 = inlined_call_operand.hbm [shape: f32[128,256], index: 3, kind: input, shape index: {}]   ;;  %s2901_s4 = inlined_call_operand.vmem [shape: f32[1,128], index: 4, kind: input, shape index: {}]   ;;  %s2902_s5 = inlined_call_operand.vmem [shape: f32[1,256], index: 5, kind: input, shape index: {}]   ;;  %s2903_s6 = inlined_call_operand.hbm [shape: f32[4,32,128], index: 6, kind: input, shape index: {}]   ;;  %s2904_s7 = inlined_call_operand.vmem [shape: f32[1,128], index: 7, kind: input, shape index: {}]   ;;  %s2905_s8 = inlined_call_operand.hbm [shape: f32[2,8,128], index: 8, kind: output, shape index: {}]  }
   0x1   :  { %2916 = sst [smem:[#allocation20_spill]] %s2899_s2 }
   0x2   :  { %2917 = sst [smem:[#allocation21_spill]] %s2900_s3 }
   0x3   :  { %2918 = sst [smem:[#allocation22_spill]] %s2903_s6 }
   0x4   :  { %2919 = sst [smem:[#allocation23_spill]] %s2905_s8 }
   0x5   :  { %13 = vsyncpa [#allocation3], 0 }
   0x6   :  { %15 = vsyncpa [#allocation3 + $0x1], 0 }
   0x7   :  { %16 = vsyncpa [#allocation6], 0 }
   0x8   :  { %18 = vsyncpa [#allocation6 + $0x1], 0 }
   0x9   :  { %19 = vsyncpa [#allocation9], 0 }
   0xa   :  { %20 = vsyncpa [#allocation4], 0 }
   0xb   :  { %22 = vsyncpa [#allocation4 + $0x1], 0  ;;  %s2472_s27 = smov 0   ;;  %s2474_s28 = smov 0  }
   0xc   :  { %s2476_s29 = smov 0   ;;  %s2478_s30 = smov 0  }
   0xd   :  { %s2480_s9 = smov 0   ;;  %s2482_s10 = smov 0  }
   0xe LB: > { %2920 = sst [smem:[#allocation17_spill]] %s2389_s27  ;;  %s2503_s11 = sadd.s32 4294967295, %s2409_s10   ;;  %s2409_s10 = sphi %s2482_s10, %s28_s10   ;;  %s2405_s9 = sphi %s2480_s9, %s2954_s9   ;;  %s2401_s30 = sphi %s2478_s30, %s2953_s30   ;;  %s2397_s29 = sphi %s2476_s29, %s2952_s29   ;;  %s2393_s28 = sphi %s2474_s28, %s2951_s28   ;;  %s2389_s27 = sphi %s2472_s27, %s2950_s27  }
   0xf   : > { %s1756_s12 = sadd.s32 4294967294, %s2409_s10   ;;  %p62_p0 = scmp.ne.s32.totalorder %s2393_s28, %s2389_s27 }
  0x10   : > { %p2906_p1 = scmp.eq.s32.totalorder %s2503_s11, 0  ;;  %p246_p3 = scmp.eq.s32.totalorder %s1756_s12, 1 }
  0x11   : > { %p1757_p5 = scmp.ge.s32.totalorder %s2409_s10, 1  ;;  %p253_p7 = scmp.lt.s32.totalorder %s2409_s10, 3 }
  0x12   : > { %p2512_p4 = por %p2906_p1, %p62_p0  ;;  %p2517_p6 = por %p246_p3, %p62_p0 }
  0x13   : > { %p2522_p8 = pnand %p1757_p5, %p253_p7  ;;  %s2411_s16 = smov [#allocation7]  }
  0x14   : > { %s2921_s13 = scalar_select %p2512_p4, 1, 0 }
  0x15   : > { %s2922_s14 = scalar_select %p2517_p6, 1, 0 }
  0x16   : > { %s2924_s15 = scalar_select %p2522_p8, 1, 0 }
  0x17   : > { %2923 = sst [smem:[#allocation18_spill]] %s2922_s14  ;;  %s265_s17 = sshll.u32 %s2411_s16, 4  ;;  %s2526_s17 = int_to_ptr.vmem [resolvable:$true] %s265_s17 }
  0x18   : > { %p2065_p9 = pneg %p2522_p8  ;;  %s2412_s19 = smov [#allocation8]  }
  0x19   : > { %s278_s20 = sshll.u32 %s2412_s19, 4  ;;  %s2926_s2 = sld [smem:[#allocation20_spill]]  ;;  %s2537_s20 = int_to_ptr.vmem [resolvable:$true] %s278_s20 }
  0x1a   : > { %p2533_p11 = pnand %p2065_p9, %p2906_p1 }
  0x1c   : > { %p2547_p13 = pneg %p2533_p11 }
  0x1f   : > { %s2171_s23 = scalar_lea.hbm %s2926_s2, 2048 }
  0x20   : > { %p2172_p12 = scmp.ne.s32.totalorder %s2926_s2, %s2171_s23  ;;  %p2178_p5 = scmp.lt.u32.totalorder %s2171_s23, %s2926_s2 }
  0x22   : > { %p2174_p0 = pnand %p2547_p13, %p2172_p12 }
  0x24   : > { %p2175_p3 = pneg %p2174_p0 }
  0x26   : > { %p2180_p7 = pnand %p2178_p5, %p2175_p3 }
  0x28   : > { %2183 = shalt.err (!%p2180_p7)
}
  0x29   : > { %s2184_s19 = scalar_lea.vmem %s2526_s17, 2048  ;;  %p2192_p2 = scmp.lt.s32.totalorder %s2526_s17, %s2526_s17 }
  0x2a   : > { %p2185_p9 = scmp.ne.s32.totalorder %s2526_s17, %s2184_s19  ;;  %p2193_p6 = scmp.lt.s32.totalorder %s2184_s19, %s2184_s19 }
  0x2c   : > { %p2187_p10 = pnand %p2185_p9, %p2547_p13  ;;  %p2194_p12 = por %p2193_p6, %p2192_p2 }
  0x2e   : > { %p2188_p1 = pneg %p2187_p10 }
  0x30   : > { %p2195_p0 = pnand %p2194_p12, %p2188_p1 }
  0x32   : > { %2198 = shalt.err (!%p2195_p0)
}
  0x33   : > { %s2910_s21 = smov 128   ;;  %s2911_s22 = smov 8  }
  0x34   : > { %2068 = dma.hbm_to_vmem [thread:$0]  (!%p2533_p11), %s2926_s2, 2048, %s2526_s17, [#allocation6], %s2910_s21, %s2910_s21, %s2911_s22  }
  0x35   : > { %s2928_s3 = sld [smem:[#allocation21_spill]] }
  0x3b   : > { %s2199_s16 = scalar_lea.hbm %s2928_s3, 4096 }
  0x3c   : > { %p2200_p1 = scmp.ne.s32.totalorder %s2928_s3, %s2199_s16  ;;  %p2206_p10 = scmp.lt.u32.totalorder %s2199_s16, %s2928_s3 }
  0x3e   : > { %p2202_p2 = pnand %p2200_p1, %p2547_p13 }
  0x40   : > { %p2203_p6 = pneg %p2202_p2 }
  0x42   : > { %p2208_p3 = pnand %p2206_p10, %p2203_p6 }
  0x44   : > { %2211 = shalt.err (!%p2208_p3)
}
  0x45   : > { %s2212_s17 = scalar_lea.vmem %s2537_s20, 4096  ;;  %p2220_p12 = scmp.lt.s32.totalorder %s2537_s20, %s2537_s20 }
  0x46   : > { %p2213_p5 = scmp.ne.s32.totalorder %s2537_s20, %s2212_s17  ;;  %p2221_p0 = scmp.lt.s32.totalorder %s2212_s17, %s2212_s17 }
  0x48   : > { %p2215_p7 = pnand %p2213_p5, %p2547_p13  ;;  %p2222_p1 = por %p2221_p0, %p2220_p12 }
  0x4a   : > { %p2216_p9 = pneg %p2215_p7 }
  0x4c   : > { %p2223_p2 = pnand %p2222_p1, %p2216_p9 }
  0x4e   : > { %2226 = shalt.err (!%p2223_p2)
}
  0x4f   : > { %s2415_s14 = smov 256   ;;  %s2416_s8 = smov 16  }
  0x50   : > { %2071 = dma.hbm_to_vmem [thread:$0]  (!%p2533_p11), %s2928_s3, 4096, %s2537_s20, [#allocation9], %s2415_s14, %s2415_s14, %s2416_s8  }
  0x51   : > { %s2417_s24 = smov [#allocation10]   ;;  %s2929_s6 = sld [smem:[#allocation22_spill]] }
  0x52   : > { %s297_s25 = sshll.u32 %s2417_s24, 4  ;;  %s298_s25 = int_to_ptr.vmem [resolvable:$true] %s297_s25 }
  0x57   : > { %s2227_s19 = scalar_lea.hbm %s2929_s6, 2048 }
  0x58   : > { %p2228_p6 = scmp.ne.s32.totalorder %s2929_s6, %s2227_s19  ;;  %p2234_p5 = scmp.lt.u32.totalorder %s2227_s19, %s2929_s6 }
  0x5a   : > { %p2230_p10 = pnand %p2228_p6, %p2547_p13 }
  0x5c   : > { %p2231_p3 = pneg %p2230_p10 }
  0x5e   : > { %p2236_p7 = pnand %p2234_p5, %p2231_p3 }
  0x60   : > { %2239 = shalt.err (!%p2236_p7)
}
  0x61   : > { %s2240_s20 = scalar_lea.vmem %s298_s25, 2048  ;;  %p2248_p1 = scmp.lt.s32.totalorder %s298_s25, %s298_s25 }
  0x62   : > { %p2241_p9 = scmp.ne.s32.totalorder %s298_s25, %s2240_s20  ;;  %p2249_p2 = scmp.lt.s32.totalorder %s2240_s20, %s2240_s20 }
  0x64   : > { %p2243_p12 = pnand %p2241_p9, %p2547_p13  ;;  %p2250_p4 = por %p2249_p2, %p2248_p1 }
  0x66   : > { %p2244_p0 = pneg %p2243_p12 }
  0x68   : > { %p2251_p8 = pnand %p2250_p4, %p2244_p0 }
  0x6a   : > { %2254 = shalt.err (!%p2251_p8)
}
  0x6b   : > { %s2930_s21 = smov 8   ;;  %s2931_s14 = smov 128  }
  0x6c   : > { %2074 = dma.hbm_to_vmem [thread:$0]  (!%p2533_p11), %s2929_s6, 2048, %s298_s25, [#allocation9], %s2931_s14, %s2931_s14, %s2930_s21  }
  0x6d   : > { %s40_s26 = sadd.s32 1, %s2405_s9  ;;  %s49_s18 = sadd.s32 1, %s2397_s29 }
  0x6e   : > { %p42_p4 = scmp.ge.s32.totalorder %s40_s26, 2  ;;  %p56_p8 = scmp.ne.s32.totalorder %s2397_s29, %s2393_s28 }
  0x6f   : > { %p57_p13 = scmp.eq.s32.totalorder %s2409_s10, 0  ;;  %p2934_p10 = scmp.eq.s32.totalorder %s2503_s11, 1 }
  0x70   : > { %s2956_s26 = smov (%p42_p4, %s40_s26), 0  ;;  %p2089_p11 = scmp.lt.s32.totalorder %s2409_s10, 2 }
  0x71   : > { %2932 = sst [smem:[#allocation19_spill]] %s2956_s26  ;;  %p2622_p6 = por %p57_p13, %p56_p8 }
  0x72   : > { %p2628_p3 = por %p2934_p10, %p56_p8  ;;  %s44_s23 = ssub.s32 %s2405_s9, %s2956_s26 }
  0x73   : > { %p47_p5 = scmp.eq.s32.totalorder %s44_s23, 0  ;;  %s314_s24 = sand.u32 1, %s2397_s29  }
  0x74   : > { %s2935_s27 = scalar_select %p2628_p3, 1, 0 }
  0x75   : > { %s2636_s25 = sshll.u32 %s314_s24, 3  ;;  %s1763_s16 = sshll.u32 %s2405_s9, 7 }
  0x76   : > { %s2639_s12 = scalar_select %p47_p5, %s2397_s29, %s49_s18  }
  0x77   : > { %s2645_s20 = scalar_lea.hbm %s2897_s0, %s1763_s16  ;;  %s318_s21 = scalar_lea.vmem [#allocation2], %s2636_s25 }
  0x78   : > { %s326_s14 = sshll.u32 %s318_s21, 4  ;;  %p2652_p7 = pnand %p2089_p11, %p2622_p6  ;;  %s2648_s14 = int_to_ptr.vmem [resolvable:$true] %s326_s14 }
  0x79   : > { %s2659_s23 = scalar_lea.hbm %s2898_s1, %s1763_s16  ;;  %s333_s19 = sand.u32 1, %s2409_s10  }
  0x7a   : > { %s315_s17 = scalar_lea.sflag [#allocation3], %s314_s24  ;;  %s2255_s3 = scalar_lea.hbm %s2645_s20, 128 }
  0x7b   : > { %p2256_p9 = scmp.ne.s32.totalorder %s2645_s20, %s2255_s3  ;;  %p2257_p12 = pneg %p2652_p7 }
  0x7c   : > { %s2260_s6 = scalar_lea.hbm %s2897_s0, 256  ;;  %p2261_p2 = scmp.lt.u32.totalorder %s2645_s20, %s2897_s0 }
  0x7d   : > { %p2258_p0 = pnand %p2257_p12, %p2256_p9  ;;  %p2262_p4 = scmp.lt.u32.totalorder %s2260_s6, %s2255_s3 }
  0x7e   : > { %p2264_p13 = scmp.lt.u32.totalorder %s2255_s3, %s2645_s20 }
  0x7f   : > { %p2259_p1 = pneg %p2258_p0  ;;  %p2263_p8 = por %p2262_p4, %p2261_p2 }
  0x81   : > { %p2265_p6 = por %p2264_p13, %p2263_p8 }
  0x83   : > { %p2266_p10 = pnand %p2265_p6, %p2259_p1 }
  0x85   : > { %2269 = shalt.err (!%p2266_p10)
}
  0x86   : > { %s2270_s24 = scalar_lea.vmem %s2648_s14, 128  ;;  %s2418_s16 = smov [#allocation2]  }
  0x87   : > { %p2271_p11 = scmp.ne.s32.totalorder %s2648_s14, %s2270_s24  ;;  %s2275_s18 = sshll.u32 %s2418_s16, 4  ;;  %s2276_s18 = int_to_ptr.vmem [resolvable:$false] %s2275_s18 }
  0x88   : > { %s2277_s26 = scalar_lea.vmem %s2276_s18, 256  ;;  %p2278_p0 = scmp.lt.s32.totalorder %s2648_s14, %s2276_s18 }
  0x89   : > { %p2273_p5 = pnand %p2271_p11, %p2257_p12  ;;  %p2279_p2 = scmp.lt.s32.totalorder %s2277_s26, %s2270_s24 }
  0x8b   : > { %p2274_p9 = pneg %p2273_p5  ;;  %p2280_p4 = por %p2279_p2, %p2278_p0 }
  0x8d   : > { %p2281_p8 = pnand %p2280_p4, %p2274_p9 }
  0x8f   : > { %2284 = shalt.err (!%p2281_p8)
}
  0x90   : > { %2078 = dma.hbm_to_vmem [thread:$0]  (!%p2652_p7), %s2645_s20, 128, %s2648_s14, %s315_s17  }
  0x91   : > { %s337_s3 = scalar_lea.vmem [#allocation5], %s2636_s25  ;;  %s334_s8 = scalar_lea.sflag [#allocation6], %s333_s19 }
  0x92   : > { %s344_s6 = sshll.u32 %s337_s3, 4  ;;  %s2285_s21 = scalar_lea.hbm %s2659_s23, 128  ;;  %s345_s6 = int_to_ptr.vmem [resolvable:$true] %s344_s6 }
  0x93   : > { %p2286_p1 = scmp.ne.s32.totalorder %s2659_s23, %s2285_s21  ;;  %s2290_s16 = scalar_lea.hbm %s2898_s1, 256 }
  0x94   : > { %p2291_p10 = scmp.lt.u32.totalorder %s2659_s23, %s2898_s1  ;;  %p2292_p11 = scmp.lt.u32.totalorder %s2290_s16, %s2285_s21 }
  0x95   : > { %p2288_p13 = pnand %p2286_p1, %p2257_p12  ;;  %p2294_p9 = scmp.lt.u32.totalorder %s2285_s21, %s2659_s23 }
  0x96   : > { %p2293_p5 = por %p2292_p11, %p2291_p10 }
  0x97   : > { %p2289_p6 = pneg %p2288_p13 }
  0x98   : > { %p2295_p0 = por %p2294_p9, %p2293_p5 }
  0x9a   : > { %p2296_p2 = pnand %p2295_p0, %p2289_p6 }
  0x9c   : > { %2299 = shalt.err (!%p2296_p2)
}
  0x9d   : > { %s2300_s25 = scalar_lea.vmem %s345_s6, 128  ;;  %s2419_s20 = smov [#allocation5]  }
  0x9e   : > { %p2301_p4 = scmp.ne.s32.totalorder %s345_s6, %s2300_s25  ;;  %s2305_s14 = sshll.u32 %s2419_s20, 4  ;;  %s2306_s14 = int_to_ptr.vmem [resolvable:$false] %s2305_s14 }
  0x9f   : > { %s2307_s19 = scalar_lea.vmem %s2306_s14, 256  ;;  %p2308_p13 = scmp.lt.s32.totalorder %s345_s6, %s2306_s14 }
  0xa0   : > { %p2303_p8 = pnand %p2301_p4, %p2257_p12  ;;  %p2309_p3 = scmp.lt.s32.totalorder %s2307_s19, %s2300_s25 }
  0xa2   : > { %p2304_p1 = pneg %p2303_p8  ;;  %p2310_p10 = por %p2309_p3, %p2308_p13 }
  0xa4   : > { %p2311_p11 = pnand %p2310_p10, %p2304_p1 }
  0xa6   : > { %2314 = shalt.err (!%p2311_p11)
}
  0xa7   : > { %2081 = dma.hbm_to_vmem [thread:$0]  (!%p2652_p7), %s2659_s23, 128, %s345_s6, %s334_s8  }
  0xa8   : > { %p2937_p6 = scmp.ne.s32.totalorder %s2924_s15, 0 }
  0xa9   : > { %s2712_s17 = sand.u32 (!%p2937_p6), 1, %s2393_s28   ;;  %p2938_p3 = scmp.ne.s32.totalorder (!%p2937_p6), %s2921_s13, 0 }
  0xaa   : > { %353 = sbr.rel (%p2937_p6) target bundleno = 2795 (0xaeb), region = 52  ;;  %s2715_s3 = sshll.u32 (!%p2937_p6), %s2712_s17, 3 }
  0xab   : > { %s356_s21 = scalar_lea.sflag (!%p2937_p6), [#allocation3], %s2712_s17  ;;  %s359_s22 = scalar_lea.vmem (!%p2937_p6), [#allocation2], %s2715_s3 }
  0xb1   : > { %2368 = dma.done.wait (%p2938_p3), %s356_s21, 128  }
  0xb2   : > { %2370 = vsyncadd (%p2938_p3), %s356_s21, 4294967168  ;;  %s364_s15 = sand.u32 1, %s2503_s11   ;;  %s368_s23 = scalar_lea.vmem [#allocation5], %s2715_s3 }
  0xb3   : > { %s365_s2 = scalar_lea.sflag [#allocation6], %s364_s15 }
  0xb4   : > { %2372 = dma.done.wait (%p2938_p3), %s365_s2, 128  }
  0xb5   : > { %2374 = vsyncadd (%p2938_p3), %s365_s2, 4294967168  ;;  %p2939_p7 = scmp.eq.s32.totalorder %s2503_s11, 0 }
  0xb7   : > { %2376 = dma.done.wait (%p2939_p7), [#allocation6], 2048   ;;  %p2940_p12 = pmov %p2939_p7 }
  0xb8   : > { %p2941_p5 = pmov %p2939_p7 }
  0xb9   : > { %2378 = vsyncadd (%p2940_p12), [#allocation6], 4294965248 }
  0xba   : > { %2380 = dma.done.wait (%p2941_p5), [#allocation9], 6144   ;;  %p2942_p9 = pmov %p2941_p5 }
  0xbb   : > { %v2420_v0 = vmov 0.0|0.0   ;;  %v2421_v1 = vmov 0.0   ;;  %vm2422_vm0 = vmmov 0   ;;  %v514_v2 = vld [vmem:[#allocation8 + $0x8] sm:$0xff]  ;;  %v516_v3 = vld [vmem:[#allocation8 + $0x18] sm:$0xff]  ;;  %v513_v4 = vld [vmem:[#allocation8] sm:$0xff] }
  0xbc   : > { %2382 = vsyncadd (%p2942_p9), [#allocation9], 4294961152  ;;  %1967 = vmatprep.subr.bf16.mxu0 %v2420_v0  ;;  %621 = vmatprep.mubr.f32.mxu1 %v2421_v1  ;;  %v1991_v5 = vpack.c.bf16 %v516_v3, %v514_v2  ;;  %v515_v6 = vld [vmem:[#allocation8 + $0x10] sm:$0xff]  ;;  %v420_v7 = vld [vmem:[#allocation7] sm:$0xff]  ;;  %vm629_vm1 = vcmask 261120   ;;  %s2423_s24 = smov 96  }
  0xbd   : > { %1880 = vmatprep.mubr.msk.f32.mxu0 %vm2422_vm0, %v2421_v1  ;;  %v421_v8 = vld [vmem:[#allocation7 + $0x8] sm:$0xff]  ;;  %v1993_v9 = vpack.c.bf16 %v515_v6, %v513_v4  ;;  %v520_v12 = vld [vmem:[#allocation8 + $0x38] sm:$0xff]  ;;  %v517_v13 = vld [vmem:[#allocation8 + $0x20] sm:$0xff]  ;;  %vm706_vm2 = vcmask 64512   ;;  %s2424_s16 = smov 64   ;;  %s2425_s18 = smov 32  }
  0xbe   : > { %v1968_v10 = vpack.c.bf16 %v421_v8, %v420_v7  ;;  %v518_v11 = vld [vmem:[#allocation8 + $0x28] sm:$0xff]  ;;  %1992 = vmatprep.subr.bf16.mxu1 %v1991_v5  ;;  %v519_v15 = vld [vmem:[#allocation8 + $0x30] sm:$0xff]  ;;  %v423_v17 = vld [vmem:[#allocation7 + $0x18] sm:$0xff]  ;;  %s1792_s20 = sshll.u32 %s2401_s30, 7  ;;  %s417_s14 = scalar_lea.vmem [#allocation11], %s2715_s3 }
  0xbf   : > { %v1995_v14 = vpack.c.bf16 %v520_v12, %v518_v11  ;;  %v422_v16 = vld [vmem:[#allocation7 + $0x10] sm:$0xff]  ;;  %1994 = vmatpush1.bf16.msra.mxu1 %v1993_v9  ;;  %v1997_v18 = vpack.c.bf16 %v519_v15, %v517_v13  ;;  %v522_v20 = vld [vmem:[#allocation8 + $0x48] sm:$0xff]  ;;  %v524_v21 = vld [vmem:[#allocation8 + $0x58] sm:$0xff]  ;;  %s1624_s19 = sshll.u32 %s417_s14, 4  ;;  %s2943_s15 = sld [smem:[#allocation23_spill]]  ;;  %s2850_s19 = int_to_ptr.vmem [resolvable:$true] %s1624_s19 }
  0xc0   : > { %1969 = vmatpush3.bf16.msra.mxu0 %v1968_v10  ;;  %v1971_v19 = vpack.c.bf16 %v423_v17, %v422_v16  ;;  %v521_v22 = vld [vmem:[#allocation8 + $0x40] sm:$0xff]  ;;  %v1999_v23 = vpack.c.bf16 %v524_v21, %v522_v20  ;;  %v523_v24 = vld [vmem:[#allocation8 + $0x50] sm:$0xff]  ;;  %v425_v26 = vld [vmem:[#allocation7 + $0x28] sm:$0xff]  ;;  %s2315_s11 = scalar_lea.vmem %s2850_s19, 128  ;;  %p2944_p2 = scmp.ne.s32.totalorder %s2935_s27, 0 }
  0xc1   : > { %1996 = vmatprep.subr.bf16.mxu1 %v1995_v14  ;;  %1970 = vmatprep.subr.bf16.mxu0 %v2420_v0  ;;  %v424_v25 = vld [vmem:[#allocation7 + $0x20] sm:$0xff]  ;;  %v526_v27 = vld [vmem:[#allocation8 + $0x68] sm:$0xff]  ;;  %v528_v28 = vld [vmem:[#allocation8 + $0x78] sm:$0xff]  ;;  %v2001_v29 = vpack.c.bf16 %v523_v24, %v521_v22  ;;  %v547_v14 = vlaneseq  ;;  %p2316_p0 = scmp.ne.s32.totalorder %s2850_s19, %s2315_s11  ;;  %s2426_s30 = smov [#allocation11]  }
  0xc2   : > { %v1974_v30 = vpack.c.bf16 %v425_v26, %v424_v25  ;;  %v525_v31 = vld [vmem:[#allocation8 + $0x60] sm:$0xff]  ;;  %v2003_v32 = vpack.c.bf16 %v528_v28, %v526_v27  ;;  %v527_v33 = vld [vmem:[#allocation8 + $0x70] sm:$0xff]  ;;  %v427_v35 = vld [vmem:[#allocation7 + $0x38] sm:$0xff]  ;;  %s2319_s3 = sshll.u32 %s2426_s30, 4  ;;  %s2320_s3 = int_to_ptr.vmem [resolvable:$false] %s2319_s3 }
  0xc3   : > { %1998 = vmatpush1.bf16.msra.mxu1 %v1997_v18  ;;  %v426_v34 = vld [vmem:[#allocation7 + $0x30] sm:$0xff]  ;;  %v530_v36 = vld [vmem:[#allocation8 + $0x88] sm:$0xff]  ;;  %v532_v37 = vld [vmem:[#allocation8 + $0x98] sm:$0xff]  ;;  %v2005_v38 = vpack.c.bf16 %v527_v33, %v525_v31  ;;  %v548_v15 = vshrl.u32 %v547_v14, 7  ;;  %p2317_p4 = pnand %p2316_p0, %p2944_p2  ;;  %s2321_s13 = scalar_lea.vmem %s2320_s3, 256 }
  0xc4   : > { %1972 = vmatpush3.bf16.msra.mxu0 %v1971_v19  ;;  %2000 = vmatprep.subr.bf16.mxu1 %v1999_v23  ;;  %v1977_v39 = vpack.c.bf16 %v427_v35, %v426_v34  ;;  %v529_v40 = vld [vmem:[#allocation8 + $0x80] sm:$0xff]  ;;  %v2007_v41 = vpack.c.bf16 %v532_v37, %v530_v36  ;;  %v531_v42 = vld [vmem:[#allocation8 + $0x90] sm:$0xff]  ;;  %v429_v44 = vld [vmem:[#allocation7 + $0x48] sm:$0xff]  ;;  %p2322_p1 = scmp.lt.s32.totalorder %s2850_s19, %s2320_s3  ;;  %p2323_p13 = scmp.lt.s32.totalorder %s2321_s13, %s2315_s11 }
  0xc5   : > { %1973 = vmatprep.subr.bf16.mxu0 %v2420_v0  ;;  %v428_v43 = vld [vmem:[#allocation7 + $0x40] sm:$0xff]  ;;  %v534_v45 = vld [vmem:[#allocation8 + $0xa8] sm:$0xff]  ;;  %v536_v46 = vld [vmem:[#allocation8 + $0xb8] sm:$0xff]  ;;  %v2009_v47 = vpack.c.bf16 %v531_v42, %v529_v40  ;;  %v549_v16 = vsub.s32 0, %v548_v15  ;;  %v553_v19 = vsub.s32 1, %v548_v15  ;;  %s2848_s2 = scalar_lea.hbm %s2943_s15, %s1792_s20  ;;  %p2318_p8 = pneg %p2317_p4 }
  0xc6   : > { %v1980_v48 = vpack.c.bf16 %v429_v44, %v428_v43  ;;  %v533_v49 = vld [vmem:[#allocation8 + $0xa0] sm:$0xff]  ;;  %v2011_v50 = vpack.c.bf16 %v536_v46, %v534_v45  ;;  %v535_v51 = vld [vmem:[#allocation8 + $0xb0] sm:$0xff]  ;;  %v431_v53 = vld [vmem:[#allocation7 + $0x58] sm:$0xff]  ;;  %p2324_p10 = por %p2323_p13, %p2322_p1 }
  0xc7   : > { %2002 = vmatpush1.bf16.msra.mxu1 %v2001_v29  ;;  %v430_v52 = vld [vmem:[#allocation7 + $0x50] sm:$0xff]  ;;  %v538_v54 = vld [vmem:[#allocation8 + $0xc8] sm:$0xff]  ;;  %v540_v55 = vld [vmem:[#allocation8 + $0xd8] sm:$0xff]  ;;  %v2013_v56 = vpack.c.bf16 %v535_v51, %v533_v49 }
  0xc8   : > { %1975 = vmatpush3.bf16.msra.mxu0 %v1974_v30  ;;  %2004 = vmatprep.subr.bf16.mxu1 %v2003_v32  ;;  %v1983_v57 = vpack.c.bf16 %v431_v53, %v430_v52  ;;  %v537_v58 = vld [vmem:[#allocation8 + $0xc0] sm:$0xff]  ;;  %v2015_v59 = vpack.c.bf16 %v540_v55, %v538_v54  ;;  %v539_v60 = vld [vmem:[#allocation8 + $0xd0] sm:$0xff]  ;;  %v433_v62 = vld [vmem:[#allocation7 + $0x68] sm:$0xff]  ;;  %p2325_p11 = pnand %p2324_p10, %p2318_p8 }
  0xc9   : > { %1976 = vmatprep.subr.bf16.mxu0 %v2420_v0  ;;  %v432_v61 = vld [vmem:[#allocation7 + $0x60] sm:$0xff]  ;;  %v542_v63 = vld [vmem:[#allocation8 + $0xe8] sm:$0xff]  ;;  %v544_v2 = vld [vmem:[#allocation8 + $0xf8] sm:$0xff]  ;;  %v2017_v3 = vpack.c.bf16 %v539_v60, %v537_v58 }
  0xca   : > { %v1986_v4 = vpack.c.bf16 %v433_v62, %v432_v61  ;;  %v541_v5 = vld [vmem:[#allocation8 + $0xe0] sm:$0xff]  ;;  %v2019_v6 = vpack.c.bf16 %v544_v2, %v542_v63  ;;  %v543_v7 = vld [vmem:[#allocation8 + $0xf0] sm:$0xff]  ;;  %v435_v9 = vld [vmem:[#allocation7 + $0x78] sm:$0xff] }
  0xcb   : > { %2006 = vmatpush1.bf16.msra.mxu1 %v2005_v38  ;;  %v434_v8 = vld [vmem:[#allocation7 + $0x70] sm:$0xff]  ;;  %v2021_v10 = vpack.c.bf16 %v543_v7, %v541_v5  ;;  %v418_v13 = vld [vmem:[%s359_s22] sm:$0xff]  ;;  %v965_v55 = vld [vmem:[#allocation10 + $0x38] sm:$0xff] }
  0xcc   : > { %1978 = vmatpush3.bf16.msra.mxu0 %v1977_v39  ;;  %2008 = vmatprep.subr.bf16.mxu1 %v2007_v41  ;;  %v1989_v11 = vpack.c.bf16 %v435_v9, %v434_v8  ;;  %v419_v12 = vld [vmem:[%s368_s23] sm:$0xff]  ;;  %v545_v17 = vld [vmem:[%s2902_s5] sm:$0x3]  ;;  %v963_v52 = vld [vmem:[#allocation10 + $0x28] sm:$0xff]  ;;  %s1610_s23 = scalar_lea.sflag [#allocation4], %s2712_s17 }
  0xcd   : > { %1979 = vmatprep.subr.bf16.mxu0 %v2420_v0  ;;  %v550_v18 = vrot.slane %v545_v17, %v549_v16  ;;  %v1773_v20 = vld [vmem:[%s2901_s4] ss:$0 sm:$0xff]  ;;  %v554_v25 = vrot.slane %v545_v17, %v553_v19  ;;  %v964_v53 = vld [vmem:[#allocation10 + $0x30] sm:$0xff]  ;;  %v792_v60 = vld [vmem:[#allocation10 + $0x8] sm:$0xff] }
  0xce   : > { %v962_v51 = vld [vmem:[#allocation10 + $0x20] sm:$0xff]  ;;  %v793_v2 = vld [vmem:[#allocation10 + $0x10] sm:$0xff] }
  0xcf   : > { %2010 = vmatpush1.bf16.msra.mxu1 %v2009_v47  ;;  %v2024_v54 = vpack.c.bf16 %v963_v52, %v962_v51 }
  0xd0   : > { %1981 = vmatpush3.bf16.msra.mxu0 %v1980_v48  ;;  %2012 = vmatprep.subr.bf16.mxu1 %v2011_v50 }
  0xd1   : > { %1982 = vmatprep.subr.bf16.mxu0 %v2420_v0 }
  0xd3   : > { %2014 = vmatpush1.bf16.msra.mxu1 %v2013_v56  ;;  %v2027_v56 = vpack.c.bf16 %v965_v55, %v964_v53 }
  0xd4   : > { %1984 = vmatpush3.bf16.msra.mxu0 %v1983_v57  ;;  %2016 = vmatprep.subr.bf16.mxu1 %v2015_v59  ;;  %v791_v59 = vld [vmem:[#allocation10] sm:$0xff] }
  0xd5   : > { %1985 = vmatprep.subr.bf16.mxu0 %v2420_v0  ;;  %v2030_v62 = vpack.c.bf16 %v792_v60, %v791_v59  ;;  %v1790_v60 = vld [vmem:[%s2904_s7] ss:$0 sm:$0xff] }
  0xd7   : > { %2018 = vmatpush1.bf16.msra.mxu1 %v2017_v3  ;;  %v794_v3 = vld [vmem:[#allocation10 + $0x18] sm:$0xff] }
  0xd8   : > { %1987 = vmatpush3.bf16.msra.mxu0 %v1986_v4  ;;  %2020 = vmatprep.subr.bf16.mxu1 %v2019_v6  ;;  %v2033_v4 = vpack.c.bf16 %v794_v3, %v793_v2 }
  0xd9   : > { %1988 = vmatprep.subr.bf16.mxu0 %v2420_v0 }
  0xdb   : > { %2022 = vmatpush1.bf16.msra.mxu1 %v2021_v10 }
  0xdc   : > { %1990 = vmatpush3.bf16.msra.mxu0 %v1989_v11  ;;  %1883 = vmatprep.subr.mxu1 %v2421_v1 }
  0xdd   : > { %1893 = vmatprep.subr.mxu0 %v2421_v1 }
  0xde   : > { %622 = vmatmul.mubr.f32.vlgmr.msra.gmra.mrb[0].mxu1 %v419_v12 }
  0xdf   : > { %1881 = vmatmul.mubr.f32.vlgmr.msra.gmra.mrb[0].mxu0 %v418_v13  ;;  %1885 = vmatprep.mubr.msk.f32.mxu1 %vm2422_vm0, %v2421_v1 }
  0xe0   : > { %1895 = vmatprep.mubr.msk.f32.mxu0 %vm2422_vm0, %v2421_v1 }
 0x1b1   : > { %v623_v21 = vpop.f32.mrb[0].mxu1 }
 0x1b2   : > { %v509_v22 = vpop.f32.mrb[0].mxu0  ;;  %v624_v23 = vadd.f32 %v623_v21, %v550_v18  ;;  %v625_v26 = vpop.f32.mrb[1].mxu1 }
 0x1b3   : > { %v510_v24 = vadd.f32 %v1773_v20, %v509_v22  ;;  %v1882_v27 = vpop.f32.mrb[1].mxu0  ;;  %v2769_v29 = vadd.f32 %v625_v26, %v554_v25  ;;  %v1278_v25 = vld [vmem:[#allocation10 + $0x40] sm:$0xff]  ;;  %v1279_v26 = vld [vmem:[#allocation10 + $0x48] sm:$0xff] }
 0x1b4   : > { %797 = vrot.lane.b32.xlu0 %v624_v23, %s2423_s24  ;;  %1884 = vmatpush3.xpose.msk.msra.mxu1 %vm629_vm1, %v624_v23  ;;  %v1280_v27 = vld [vmem:[#allocation10 + $0x50] sm:$0xff] }
 0x1b5   : > { %v2764_v28 = vmul.f32 0.17677669, %v510_v24  ;;  %1888 = vmatprep.subr.mxu1 %v2421_v1 }
 0x1b7   : > { %1886 = vmatmul.mubr.msk.f32.vlgmr.msra.gmra.mrb[2].mxu1 %vm629_vm1, %v2764_v28 }
 0x1b8   : > { %795 = vrot.lane.b32.xlu0 %v2764_v28, %s2423_s24  ;;  %1889 = vmatpush3.msra.mxu1 %v2769_v29 }
 0x1b9   : > { %1890 = vmatprep.mubr.msk.f32.mxu1 %vm2422_vm0, %v2421_v1  ;;  %1898 = vmatprep.subr.mxu1 %v2421_v1 }
 0x226   : > { %v798_v30 = vpop.permute.xlu0 %797 }
 0x227   : > { %1894 = vmatpush3.xpose.msk.msra.mxu0 %vm629_vm1, %v798_v30  ;;  %v2036_v30 = vpack.c.bf16 %v1279_v26, %v1278_v25 }
 0x228   : > { %2023 = vmatprep.subr.bf16.mxu0 %v2420_v0 }
 0x22a   : > { %v796_v31 = vpop.permute.xlu0 %795 }
 0x22b   : > { %1896 = vmatmul.mubr.msk.f32.vlgmr.msra.gmra.mrb[2].mxu0 %vm629_vm1, %v796_v31  ;;  %v1281_v31 = vld [vmem:[#allocation10 + $0x58] sm:$0xff] }
 0x22c   : > { %1911 = vmatprep.mubr.msk.f32.mxu0 %vm2422_vm0, %v2421_v1  ;;  %2025 = vmatpush3.bf16.msra.mxu0 %v2024_v54 }
 0x22d   : > { %2026 = vmatprep.subr.bf16.mxu0 %v2420_v0 }
 0x230   : > { %2028 = vmatpush3.bf16.msra.mxu0 %v2027_v56 }
 0x231   : > { %1925 = vmatprep.subr.mxu0 %v2421_v1 }
 0x28a   : > { %v702_v32 = vpop.f32.mrb[2].mxu1 }
 0x28b   : > { %v1887_v33 = vpop.f32.mrb[3].mxu1  ;;  %v707_v34 = vsel %vm706_vm2, %v702_v32, -inf }
 0x28c   : > { %708 = vmax.xlane.f32.xlu1 %v707_v34 }
 0x2fe   : > { %v869_v35 = vpop.f32.mrb[2].mxu0 }
 0x2ff   : > { %v1897_v36 = vpop.f32.mrb[3].mxu0  ;;  %v873_v37 = vsel %vm706_vm2, %v869_v35, -inf }
 0x300   : > { %874 = vmax.xlane.f32.xlu1 %v873_v37 }
 0x319   : > { %v709_v38 = vpop.xlane.xlu1 %708 }
 0x31a   : > { %v710_v39 = vsub.f32 %v702_v32, %v709_v38  ;;  %v2039_v32 = vpack.c.bf16 %v1281_v31, %v1280_v27 }
 0x31c   : > { %v711_v40 = vmul.f32 1.442695, %v710_v39 }
 0x31e   : > { %2155 = vpow2.f32 %v711_v40 }
 0x328   : > { %v2156_v41 = vpop.eup %2155 }
 0x329   : > { %v713_v42 = vsel %vm706_vm2, %v2156_v41, 0.0 }
 0x32a   : > { %714 = vadd.xlane.f32.xlu0 %v713_v42 }
 0x340   : > { %1201 = vrot.lane.b32.xlu0 %v2769_v29, %s2424_s16 }
 0x344   : > { %1358 = vrot.lane.b32.xlu0 %v624_v23, %s2425_s18 }
 0x38d   : > { %v875_v43 = vpop.xlane.xlu1 %874 }
 0x38e   : > { %v876_v44 = vsub.f32 %v869_v35, %v875_v43 }
 0x390   : > { %v877_v45 = vmul.f32 1.442695, %v876_v44 }
 0x392   : > { %2157 = vpow2.f32 %v877_v45 }
 0x39c   : > { %v2158_v46 = vpop.eup %2157 }
 0x39d   : > { %v879_v47 = vsel %vm706_vm2, %v2158_v46, 0.0 }
 0x39e   : > { %880 = vadd.xlane.f32.xlu1 %v879_v47  ;;  %v1522_v47 = vld [vmem:[#allocation10 + $0x60] sm:$0xff] }
 0x3af   : > { %885 = vrot.lane.b32.xlu1 %v2769_v29, %s2423_s24 }
 0x3b3   : > { %1114 = vrot.lane.b32.xlu1 %v624_v23, %s2424_s16 }
 0x3b7   : > { %v715_v48 = vpop.xlane.xlu0 %714  ;;  %1112 = vrot.lane.b32.xlu1 %v2764_v28, %s2424_s16 }
 0x3b8   : > { %2159 = vrcp.f32 %v715_v48  ;;  %v1523_v48 = vld [vmem:[#allocation10 + $0x68] sm:$0xff] }
 0x3bb   : > { %v1202_v6 = vpop.permute.xlu0 %1201 }
 0x3bf   : > { %v1359_v33 = vpop.permute.xlu0 %1358 }
 0x3c2   : > { %v2160_v49 = vpop.eup %2159 }
 0x3c3   : > { %v717_v50 = vmul.f32 %v2160_v49, %v2156_v41  ;;  %v1524_v49 = vld [vmem:[#allocation10 + $0x70] sm:$0xff] }
 0x3c5   : > { %1891 = vmatmul.mubr.msk.f32.vlgmr.msra.gmra.mrb[4].mxu1 %vm706_vm2, %v717_v50  ;;  %v1525_v50 = vld [vmem:[#allocation10 + $0x78] sm:$0xff] }
 0x3c6   : > { %1900 = vmatprep.mubr.msk.f32.mxu1 %vm2422_vm0, %v2421_v1  ;;  %v2045_v51 = vpack.c.bf16 %v1525_v50, %v1524_v49 }
 0x42b   : > { %v881_v57 = vpop.xlane.xlu1 %880 }
 0x42c   : > { %2161 = vrcp.f32 %v881_v57 }
 0x42f   : > { %v886_v58 = vpop.permute.xlu1 %885 }
 0x430   : > { %1899 = vmatpush3.msra.mxu1 %v886_v58 }
 0x431   : > { %2029 = vmatprep.subr.bf16.mxu1 %v2420_v0 }
 0x433   : > { %v1115_v8 = vpop.permute.xlu1 %1114 }
 0x436   : > { %v2162_v61 = vpop.eup %2161 }
 0x437   : > { %v883_v63 = vmul.f32 %v2162_v61, %v2158_v46  ;;  %v1113_v11 = vpop.permute.xlu1 %1112 }
 0x439   : > { %1901 = vmatmul.mubr.msk.f32.vlgmr.msra.gmra.mrb[6].mxu1 %vm706_vm2, %v883_v63 }
 0x43a   : > { %2031 = vmatpush3.bf16.msra.mxu1 %v2030_v62  ;;  %1922 = vmatprep.mubr.msk.f32.mxu1 %vm2422_vm0, %v2421_v1 }
 0x43b   : > { %2032 = vmatprep.subr.bf16.mxu1 %v2420_v0 }
 0x43e   : > { %2034 = vmatpush3.bf16.msra.mxu1 %v2033_v4 }
 0x43f   : > { %1930 = vmatprep.subr.mxu1 %v2421_v1 }
 0x498   : > { %v787_v5 = vpop.f32.mrb[4].mxu1 }
 0x499   : > { %v1892_v7 = vpop.f32.mrb[5].mxu1  ;;  %1923 = vmatmul.mubr.msk.f32.vlgmr.msra.gmra.mrb[8].mxu1 %vm629_vm1, %v787_v5 }
 0x49a   : > { %1931 = vmatpush3.msra.mxu1 %v1202_v6  ;;  %1932 = vmatprep.mubr.msk.f32.mxu1 %vm2422_vm0, %v2421_v1 }
 0x49b   : > { %1946 = vmatprep.subr.mxu1 %v2421_v1 }
 0x50c   : > { %v957_v9 = vpop.f32.mrb[6].mxu1 }
 0x50d   : > { %v1902_v10 = vpop.f32.mrb[7].mxu1  ;;  %1912 = vmatmul.mubr.msk.f32.vlgmr.msra.gmra.mrb[4].mxu0 %vm629_vm1, %v957_v9 }
 0x50e   : > { %1926 = vmatpush3.xpose.msk.msra.mxu0 %vm629_vm1, %v1115_v8  ;;  %1927 = vmatprep.mubr.msk.f32.mxu0 %vm2422_vm0, %v2421_v1 }
 0x50f   : > { %2035 = vmatprep.subr.bf16.mxu0 %v2420_v0 }
 0x511   : > { %1928 = vmatmul.mubr.msk.f32.vlgmr.msra.gmra.mrb[6].mxu0 %vm629_vm1, %v1113_v11 }
 0x512   : > { %1943 = vmatprep.mubr.msk.f32.mxu0 %vm2422_vm0, %v2421_v1  ;;  %2037 = vmatpush3.bf16.msra.mxu0 %v2036_v30 }
 0x513   : > { %2038 = vmatprep.subr.bf16.mxu0 %v2420_v0 }
 0x516   : > { %2040 = vmatpush3.bf16.msra.mxu0 %v2039_v32 }
 0x517   : > { %2041 = vmatprep.subr.bf16.mxu0 %v2420_v0 }
 0x56c   : > { %v1108_v12 = vpop.f32.mrb[8].mxu1 }
 0x56d   : > { %v1924_v13 = vpop.f32.mrb[9].mxu1 }
 0x5e0   : > { %v1035_v14 = vpop.f32.mrb[4].mxu0 }
 0x5e1   : > { %v1109_v15 = vadd.f32 %v1108_v12, %v1035_v14  ;;  %v1913_v16 = vpop.f32.mrb[5].mxu0 }
 0x5e4   : > { %v1186_v17 = vpop.f32.mrb[6].mxu0 }
 0x5e5   : > { %v1929_v18 = vpop.f32.mrb[7].mxu0  ;;  %v1190_v19 = vsel %vm706_vm2, %v1186_v17, -inf }
 0x5e6   : > { %1191 = vmax.xlane.f32.xlu1 %v1190_v19 }
 0x673   : > { %v1192_v20 = vpop.xlane.xlu1 %1191 }
 0x674   : > { %v1193_v21 = vsub.f32 %v1186_v17, %v1192_v20 }
 0x676   : > { %v1194_v22 = vmul.f32 1.442695, %v1193_v21 }
 0x678   : > { %2163 = vpow2.f32 %v1194_v22 }
 0x682   : > { %v2164_v23 = vpop.eup %2163 }
 0x683   : > { %v1196_v24 = vsel %vm706_vm2, %v2164_v23, 0.0 }
 0x684   : > { %1197 = vadd.xlane.f32.xlu0 %v1196_v24 }
 0x69a   : > { %1356 = vrot.lane.b32.xlu0 %v2764_v28, %s2425_s18 }
 0x711   : > { %v1198_v34 = vpop.xlane.xlu0 %1197 }
 0x712   : > { %2165 = vrcp.f32 %v1198_v34 }
 0x715   : > { %v1357_v28 = vpop.permute.xlu0 %1356 }
 0x71c   : > { %v2166_v35 = vpop.eup %2165 }
 0x71d   : > { %v1200_v36 = vmul.f32 %v2166_v35, %v2164_v23 }
 0x71f   : > { %1933 = vmatmul.mubr.msk.f32.vlgmr.msra.gmra.mrb[10].mxu1 %vm706_vm2, %v1200_v36 }
 0x720   : > { %1947 = vmatpush3.xpose.msk.msra.mxu1 %vm629_vm1, %v1359_v33  ;;  %1948 = vmatprep.mubr.msk.f32.mxu1 %vm2422_vm0, %v2421_v1 }
 0x721   : > { %1951 = vmatprep.subr.mxu1 %v2421_v1 }
 0x723   : > { %1949 = vmatmul.mubr.msk.f32.vlgmr.msra.gmra.mrb[12].mxu1 %vm629_vm1, %v1357_v28 }
 0x724   : > { %1953 = vmatprep.mubr.msk.f32.mxu1 %vm2422_vm0, %v2421_v1 }
 0x7f2   : > { %v1273_v37 = vpop.f32.mrb[10].mxu1 }
 0x7f3   : > { %v1934_v38 = vpop.f32.mrb[11].mxu1  ;;  %1944 = vmatmul.mubr.msk.f32.vlgmr.msra.gmra.mrb[8].mxu0 %vm629_vm1, %v1273_v37 }
 0x7f4   : > { %1964 = vmatprep.mubr.msk.f32.mxu0 %vm2422_vm0, %v2421_v1  ;;  %v2042_v1 = vpack.c.bf16 %v1523_v48, %v1522_v47 }
 0x7f6   : > { %v1430_v39 = vpop.f32.mrb[12].mxu1  ;;  %2043 = vmatpush3.bf16.msra.mxu0 %v2042_v1 }
 0x7f7   : > { %v1950_v40 = vpop.f32.mrb[13].mxu1  ;;  %v1434_v41 = vsel %vm706_vm2, %v1430_v39, -inf  ;;  %2044 = vmatprep.subr.bf16.mxu0 %v2420_v0 }
 0x7f8   : > { %1435 = vmax.xlane.f32.xlu0 %v1434_v41 }
 0x7fa   : > { %2046 = vmatpush3.bf16.msra.mxu0 %v2045_v51 }
 0x885   : > { %v1436_v42 = vpop.xlane.xlu0 %1435 }
 0x886   : > { %v1437_v43 = vsub.f32 %v1430_v39, %v1436_v42 }
 0x888   : > { %v1438_v44 = vmul.f32 1.442695, %v1437_v43 }
 0x88a   : > { %2167 = vpow2.f32 %v1438_v44 }
 0x894   : > { %v2168_v45 = vpop.eup %2167 }
 0x895   : > { %v1440_v46 = vsel %vm706_vm2, %v2168_v45, 0.0 }
 0x896   : > { %1441 = vadd.xlane.f32.xlu1 %v1440_v46 }
 0x8a7   : > { %1445 = vrot.lane.b32.xlu1 %v2769_v29, %s2425_s18 }
 0x8c6   : > { %v1351_v52 = vpop.f32.mrb[8].mxu0 }
 0x8c7   : > { %v1355_v53 = vadd.f32 %v1351_v52, %v1109_v15  ;;  %v1945_v54 = vpop.f32.mrb[9].mxu0 }
 0x923   : > { %v1442_v55 = vpop.xlane.xlu1 %1441 }
 0x924   : > { %2169 = vrcp.f32 %v1442_v55 }
 0x927   : > { %v1446_v56 = vpop.permute.xlu1 %1445 }
 0x928   : > { %1952 = vmatpush3.msra.mxu1 %v1446_v56 }
 0x92e   : > { %v2170_v29 = vpop.eup %2169 }
 0x92f   : > { %v1444_v57 = vmul.f32 %v2170_v29, %v2168_v45 }
 0x931   : > { %1954 = vmatmul.mubr.msk.f32.vlgmr.msra.gmra.mrb[14].mxu1 %vm706_vm2, %v1444_v57 }
 0xa04   : > { %v1517_v58 = vpop.f32.mrb[14].mxu1 }
 0xa05   : > { %v1955_v59 = vpop.f32.mrb[15].mxu1  ;;  %1965 = vmatmul.mubr.msk.f32.vlgmr.msra.gmra.mrb[10].mxu0 %vm629_vm1, %v1517_v58 }
 0xad8   : > { %v1595_v0 = vpop.f32.mrb[10].mxu0 }
 0xad9   : > { %v1599_v61 = vadd.f32 %v1595_v0, %v1355_v53  ;;  %v1966_v62 = vpop.f32.mrb[11].mxu0 }
 0xadb   : > { %v1607_v63 = vadd.f32 %v1790_v60, %v1599_v61 }
 0xadd   : > { %1608 = vst [vmem:[%s417_s14] sm:$0xff] %v1607_v63 }
 0xade   : > { %2328 = shalt.err (!%p2325_p11)
}
 0xadf   : > { %s2329_s17 = scalar_lea.hbm %s2848_s2, 128  ;;  %s2333_s24 = scalar_lea.hbm %s2943_s15, 256 }
 0xae0   : > { %p2330_p6 = scmp.ne.s32.totalorder %s2848_s2, %s2329_s17  ;;  %p2334_p12 = scmp.lt.u32.totalorder %s2848_s2, %s2943_s15 }
 0xae1   : > { %p2335_p5 = scmp.lt.u32.totalorder %s2333_s24, %s2329_s17  ;;  %p2337_p0 = scmp.lt.u32.totalorder %s2329_s17, %s2848_s2 }
 0xae2   : > { %p2331_p3 = pnand %p2330_p6, %p2944_p2 }
 0xae3   : > { %p2336_p9 = por %p2335_p5, %p2334_p12 }
 0xae4   : > { %p2332_p7 = pneg %p2331_p3 }
 0xae5   : > { %p2338_p4 = por %p2337_p0, %p2336_p9 }
 0xae7   : > { %p2339_p8 = pnand %p2338_p4, %p2332_p7 }
 0xae9   : > { %2342 = shalt.err (!%p2339_p8)
}
 0xaea   : > { %2063 = dma.vmem_to_hbm [thread:$0]  (%p2944_p2), %s2850_s19, 128, %s2848_s2, %s1610_s23  }
 0xaeb PF: > { %s2945_s26 = sld [smem:[#allocation17_spill]]  ;;  %s2946_s25 = sld [smem:[#allocation18_spill]] }
 0xaec   : > { %p2948_p13 = scmp.ge.s32.totalorder %s2409_s10, 2 }
 0xaf1   : > { %s1636_s20 = sand.u32 1, %s2945_s26   ;;  %p2947_p1 = scmp.ne.s32.totalorder %s2946_s25, 0 }
 0xaf2   : > { %s1637_s14 = scalar_lea.sflag [#allocation4], %s1636_s20 }
 0xaf3   : > { %p2083_p10 = pnand %p2948_p13, %p2947_p1 }
 0xaf5   : > { %2384 = dma.done.wait (!%p2083_p10), %s1637_s14, 128  }
 0xaf6   : > { %2386 = vsyncadd (!%p2083_p10), %s1637_s14, 4294967168  ;;  %s28_s10 = sadd.s32 1, %s2409_s10   ;;  %s2949_s21 = sld [smem:[#allocation19_spill]] }
 0xaf7   : > { %p25_p11 = scmp.ge.s32.totalorder %s28_s10, 4   ;;  %s2950_s27 = smov %s2393_s28 }
 0xaf8   : > { %s2951_s28 = smov %s2397_s29  ;;  %s2952_s29 = smov %s2639_s12 }
 0xaf9   : > { %s2953_s30 = smov %s2405_s9  ;;  %27 = sbr.rel (!%p25_p11) target bundleno = 14 (0xe), region = 125 }
 0xafc   : > { %s2954_s9 = smov %s2949_s21 }
 0xb00   :  { %1642 = vsyncpa [#allocation3], 1 }
 0xb01   :  { %1644 = vsyncpa [#allocation3 + $0x1], 1 }
 0xb02   :  { %1645 = vsyncpa [#allocation6], 1 }
 0xb03   :  { %1647 = vsyncpa [#allocation6 + $0x1], 1 }
 0xb04   :  { %1648 = vsyncpa [#allocation9], 1 }
 0xb05   :  { %1649 = vsyncpa [#allocation4], 1 }
 0xb06   :  { %1651 = vsyncpa [#allocation4 + $0x1], 1 }

</bundles_post_ra>
